<compile_context>
chip_gen: v7x
topology: tpu7x:2x2x1
jax: 0.10.0
libtpu: 0.0.40
codegen_flags: <defaults>
</compile_context>

<pallas_src>
import jax
import jax.numpy as jnp
from jax.experimental import pallas as pl
from jax.experimental.pallas import tpu as pltpu


_LANES = 512           # lane-dense slab width (multiple of 128)
_MAX_TILE_ROWS = 1024  # 1024 x 512 f32 = 2 MiB/tile -> ~8 MiB double-buffered


def _relu_kernel(f_ref, o_ref):
    # Elementwise nonlinearity on one lane-dense (tile_rows, LANES) block.
    o_ref[...] = jnp.maximum(f_ref[...], 0)


def _relu_slab(slab: jax.Array, tile_rows: int) -> jax.Array:
    rows, lanes = slab.shape
    grid = (rows // tile_rows,)
    return pl.pallas_call(
        _relu_kernel,
        out_shape=jax.ShapeDtypeStruct((rows, lanes), slab.dtype),
        grid_spec=pltpu.PrefetchScalarGridSpec(
            num_scalar_prefetch=0,
            grid=grid,
            in_specs=[pl.BlockSpec((tile_rows, lanes), lambda i: (i, 0))],
            out_specs=pl.BlockSpec((tile_rows, lanes), lambda i: (i, 0)),
        ),
        compiler_params=pltpu.CompilerParams(
            dimension_semantics=("parallel",),
            vmem_limit_bytes=32 * 1024 * 1024,
        ),
    )(slab)


def minkowski_nonlinearity(features: jax.Array) -> jax.Array:
    """Apply the wrapped elementwise module (ReLU) to features of shape (N, C).

    Handles arbitrary (ragged) N and C by flattening to a lane-dense slab,
    padding with zeros, and slicing back.
    """
    N, C = features.shape
    total = N * C
    flat = features.reshape(-1)

    rows = (total + _LANES - 1) // _LANES
    if rows <= _MAX_TILE_ROWS:
        # Single block == full array: no divisibility constraints, no grid
        # overhead for small / medium inputs.
        tile_rows = rows
        rows_padded = rows
    else:
        # Tiled path: block (1024, 512) satisfies the (8, 128) rule; pad rows
        # up to a multiple of the tile so the grid covers the slab exactly.
        tile_rows = _MAX_TILE_ROWS
        rows_padded = ((rows + tile_rows - 1) // tile_rows) * tile_rows

    padded_total = rows_padded * _LANES
    pad = padded_total - total
    if pad:
        flat = jnp.pad(flat, (0, pad))
    slab = flat.reshape(rows_padded, _LANES)

    out_slab = _relu_slab(slab, tile_rows)
    return out_slab.reshape(-1)[:total].reshape(N, C)


class MinkowskiModuleBasePallas:
    """Mirrors MinkowskiModuleBase: applies the elementwise module to input.F.

    The "SparseTensor" is represented as a dict with 'F' (features),
    'coords_key', 'coords_man' — coordinate metadata is passed through
    untouched, exactly as in the PyTorch forward.
    """

    def __call__(self, sparse_input):
        out_features = minkowski_nonlinearity(sparse_input["F"])
        return {
            "F": out_features,
            "coords_key": sparse_input["coords_key"],
            "coords_man": sparse_input["coords_man"],
        }

    def __repr__(self):
        return self.__class__.__name__ + "()"


if __name__ == "__main__":
    module = MinkowskiModuleBasePallas()
    key = jax.random.PRNGKey(0)
    k1, k2 = jax.random.split(key)

    # Case 1: small canonical shape (64 active points, 8 channels).
    N, C = 64, 8
    feats = jax.random.normal(k1, (N, C), dtype=jnp.float32)
    sparse_input = {"F": feats, "coords_key": 0, "coords_man": None}
    out = module(sparse_input)
    out_f = jax.block_until_ready(out["F"])
    ref = jnp.maximum(feats, 0.0)
    assert out_f.shape == (N, C)
    assert out_f.dtype == feats.dtype
    assert jnp.allclose(out_f, ref), "mismatch vs reference (case 1)"

    # Case 2: ragged shape (N*C not a multiple of the slab width) to exercise
    # the padding / slicing path.
    N2, C2 = 97, 24
    feats2 = jax.random.normal(k2, (N2, C2), dtype=jnp.float32)
    out2 = module({"F": feats2, "coords_key": 1, "coords_man": None})
    out_f2 = jax.block_until_ready(out2["F"])
    ref2 = jnp.maximum(feats2, 0.0)
    assert out_f2.shape == (N2, C2)
    assert jnp.allclose(out_f2, ref2), "mismatch vs reference (case 2)"

    print("KERNEL_OK")
</pallas_src>

<mosaic_0001>
module attributes {stable_mosaic.version = 11 : i64} {
  func.func @_relu_kernel(%arg0: i32, %arg1: memref<1x512xf32, #tpu.memory_space<vmem>>, %arg2: memref<1x512xf32, #tpu.memory_space<vmem>>) attributes {dimension_semantics = [#tpu.dimension_semantics<parallel>], iteration_bounds = array<i64: 1>, scalar_prefetch = 0 : i64, scratch_operands = 0 : i64, tpu.core_type = #tpu.core_type<tc>, window_params = [{transform_indices = @transform_0, window_bounds = array<i64: 1, 512>}, {transform_indices = @transform_1, window_bounds = array<i64: 1, 512>}]} {
    %c0 = arith.constant 0 : index
    %c0_0 = arith.constant 0 : index
    %0 = vector.load %arg1[%c0, %c0_0] : memref<1x512xf32, #tpu.memory_space<vmem>>, vector<1x512xf32>
    %cst = arith.constant 0.000000e+00 : f32
    %1 = vector.broadcast %cst : f32 to vector<1x512xf32>
    %2 = arith.maximumf %0, %1 : vector<1x512xf32>
    %c0_1 = arith.constant 0 : index
    %c0_2 = arith.constant 0 : index
    %3 = vector.load %arg2[%c0_1, %c0_2] : memref<1x512xf32, #tpu.memory_space<vmem>>, vector<1x512xf32>
    tpu.vector_store %arg2[%c0_1, %c0_2], %2 {strides = array<i32>} : memref<1x512xf32, #tpu.memory_space<vmem>>, vector<1x512xf32>,
    return
  }
  func.func @transform_0(%arg0: i32) -> (i32, i32) {
    %c0_i32 = arith.constant 0 : i32
    %c0_i32_0 = arith.constant 0 : i32
    return %arg0, %c0_i32 : i32, i32
  }
  func.func @transform_1(%arg0: i32) -> (i32, i32) {
    %c0_i32 = arith.constant 0 : i32
    %c0_i32_0 = arith.constant 0 : i32
    return %arg0, %c0_i32 : i32, i32
  }
}

</mosaic_0001>

<bundles_post_ra>
// kernel: tpu_custom_call.1
= control target key start
LH: loop header
LB: loop body
LE: loop exit
PB: predicated region body
PF: predicated region fallthrough
CT: control target
= control target key end

     0   :  { %6 = vsyncpa [#allocation3], 0  ;;  %s129_s0 = inlined_call_operand.hbm [shape: f32[1,512], index: 0, kind: input, shape index: {}]   ;;  %s130_s1 = inlined_call_operand.hbm [shape: f32[1,512], index: 1, kind: output, shape index: {}]  }
   0x1   :  { %7 = vsyncpa [#allocation4], 0  ;;  %s93_s6 = smov [#allocation2]   ;;  %s45_s10 = scalar_lea.hbm %s129_s0, 64 }
   0x2   :  { %s14_s7 = sshll.u32 %s93_s6, 4  ;;  %p46_p0 = scmp.ne.s32.totalorder %s129_s0, %s45_s10  ;;  %s15_s7 = int_to_ptr.vmem [resolvable:$true] %s14_s7 }
   0x3   :  { %p49_p1 = scmp.lt.u32.totalorder %s45_s10, %s129_s0 }
   0x5   :  { %p51_p2 = pnand %p49_p1, %p46_p0 }
   0x7   :  { %54 = shalt.err (!%p51_p2)
}
   0x8   :  { %s55_s15 = scalar_lea.vmem %s15_s7, 64  ;;  %p60_p4 = scmp.lt.s32.totalorder %s15_s7, %s15_s7 }
   0x9   :  { %p56_p3 = scmp.ne.s32.totalorder %s15_s7, %s55_s15  ;;  %p61_p5 = scmp.lt.s32.totalorder %s55_s15, %s55_s15 }
   0xb   :  { %p62_p6 = por %p61_p5, %p60_p4 }
   0xd   :  { %p63_p7 = pnand %p62_p6, %p56_p3 }
   0xf   :  { %66 = shalt.err (!%p63_p7)
}
  0x10   :  { %17 = dma.hbm_to_vmem [thread:$0]  %s129_s0, 64, %s15_s7, [#allocation3]  }
  0x11   :  { %89 = dma.done.wait [#allocation3], 64  }
  0x12   :  { %90 = vsyncadd [#allocation3], 4294967232  ;;  %v23_v0 = vlaneseq  ;;  %s94_s18 = smov [#allocation5]   ;;  %v21_v1 = vld [vmem:[#allocation2] sm:$0xf] }
  0x13   :  { %s34_s19 = sshll.u32 %s94_s18, 4  ;;  %v22_v2 = vmax.f32 %v21_v1, 0.0  ;;  %s35_s19 = int_to_ptr.vmem [resolvable:$true] %s34_s19 }
  0x14   :  { %vm25_vm0 = vcmp.lt.s32.totalorder %v23_v0, 512  ;;  %s67_s20 = scalar_lea.vmem %s35_s19, 64  ;;  %p72_p9 = scmp.lt.s32.totalorder %s35_s19, %s35_s19 }
  0x15   :  { %27 = vst.msk [vmem:[#allocation5] sm:$0xf] %vm25_vm0, %v22_v2  ;;  %p68_p8 = scmp.ne.s32.totalorder %s35_s19, %s67_s20  ;;  %p73_p10 = scmp.lt.s32.totalorder %s67_s20, %s67_s20 }
  0x17   :  { %p74_p11 = por %p73_p10, %p72_p9 }
  0x19   :  { %p75_p12 = pnand %p74_p11, %p68_p8 }
  0x1b   :  { %78 = shalt.err (!%p75_p12)
}
  0x1c   :  { %s79_s0 = scalar_lea.hbm %s130_s1, 64 }
  0x1d   :  { %p80_p13 = scmp.ne.s32.totalorder %s130_s1, %s79_s0  ;;  %p83_p0 = scmp.lt.u32.totalorder %s79_s0, %s130_s1 }
  0x1f   :  { %p85_p1 = pnand %p83_p0, %p80_p13 }
  0x21   :  { %88 = shalt.err (!%p85_p1)
}
  0x22   :  { %37 = dma.vmem_to_hbm [thread:$0]  %s35_s19, 64, %s130_s1, [#allocation4]  }
  0x23   :  { %91 = dma.done.wait [#allocation4], 64  }
  0x24   :  { %92 = vsyncadd [#allocation4], 4294967232 }
  0x25   :  { %41 = vsyncpa [#allocation3], 1 }
  0x26   :  { %42 = vsyncpa [#allocation4], 1 }

</bundles_post_ra>
